<compile_context>
chip_gen: v7x
topology: tpu7x:2x2x1
jax: 0.10.0
libtpu: 0.0.40
codegen_flags: <defaults>
</compile_context>

<pallas_src>
import functools

import jax
import jax.numpy as jnp
import numpy as np
from jax import lax
from jax.experimental import pallas as pl
from jax.experimental.pallas import tpu as pltpu


def _round_up(x, m):
    return (x + m - 1) // m * m


def _vmem_limit(block_bytes, scratch_bytes=0):
    # double-buffered blocks + scratch + headroom; clamp to a safe range.
    need = 2 * block_bytes + scratch_bytes + (4 << 20)
    return int(min(max(need, 32 << 20), 48 << 20))


# ----------------------------------------------------------------------------
# Training loss, in-device negatives: scores = q @ p.T, target = arange(B)*group
# Online-softmax over P tiles -> per-row NLL; mean taken in the wrapper.
# ----------------------------------------------------------------------------
def _in_device_loss_kernel(q_ref, pt_ref, nll_ref, m_ref, l_ref, sel_ref,
                           *, group, p_valid, p_tile, b_tile):
    bi = pl.program_id(0)
    pj = pl.program_id(1)

    @pl.when(pj == 0)
    def _init():
        m_ref[...] = jnp.full_like(m_ref, -1e30)
        l_ref[...] = jnp.zeros_like(l_ref)
        sel_ref[...] = jnp.zeros_like(sel_ref)

    # [b_tile, H] x [H, p_tile]  (p fed pre-transposed -> MXU-natural, no XLU
    # transpose of the big P x H slab).
    s = jnp.dot(q_ref[...], pt_ref[...], preferred_element_type=jnp.float32)

    col = lax.broadcasted_iota(jnp.int32, (b_tile, p_tile), 1) + pj * p_tile
    s = jnp.where(col < p_valid, s, -1e30)           # mask padded passage cols

    # target column for each (global) query row: row * (P // B)
    row = lax.broadcasted_iota(jnp.int32, (b_tile, p_tile), 0) + bi * b_tile
    sel_ref[...] += jnp.sum(jnp.where(col == row * group, s, 0.0),
                            axis=-1, keepdims=True)

    m_prev = m_ref[...]
    m_new = jnp.maximum(m_prev, jnp.max(s, axis=-1, keepdims=True))
    alpha = jnp.exp(m_prev - m_new)
    l_ref[...] = l_ref[...] * alpha + jnp.sum(jnp.exp(s - m_new),
                                              axis=-1, keepdims=True)
    m_ref[...] = m_new

    @pl.when(pj == pl.num_programs(1) - 1)
    def _finalize():
        nll_ref[...] = m_ref[...] + jnp.log(l_ref[...]) - sel_ref[...]


def _in_device_loss(q_cls, p_cls):
    B, H = q_cls.shape
    P, H2 = p_cls.shape
    assert H == H2 and P % B == 0
    group = P // B

    # Pad for (8,128) alignment / lane-dense tiles; mask handles the padding.
    B_pad = _round_up(B, 8)
    P_pad = _round_up(P, 128)
    p_tile = min(P_pad, 512)
    P_pad = _round_up(P_pad, p_tile)
    num_p = P_pad // p_tile

    # 2-way B split (2 TensorCores on v7x) when tiles stay 8-aligned.
    num_b = 2 if (B_pad >= 16 and B_pad % 16 == 0) else 1
    b_tile = B_pad // num_b

    q_pad = jnp.pad(q_cls, ((0, B_pad - B), (0, 0)))
    pt_pad = jnp.pad(p_cls.T, ((0, 0), (0, P_pad - P)))      # [H, P_pad]

    dsize = jnp.dtype(q_pad.dtype).itemsize
    block_bytes = (b_tile * H + H * p_tile) * dsize + b_tile * 4
    scratch_bytes = 3 * max(b_tile, 8) * 128 * 4

    kern = functools.partial(_in_device_loss_kernel, group=group, p_valid=P,
                             p_tile=p_tile, b_tile=b_tile)
    nll = pl.pallas_call(
        kern,
        out_shape=jax.ShapeDtypeStruct((B_pad, 1), jnp.float32),
        grid=(num_b, num_p),
        in_specs=[pl.BlockSpec((b_tile, H), lambda bi, pj: (bi, 0)),
                  pl.BlockSpec((H, p_tile), lambda bi, pj: (0, pj))],
        out_specs=pl.BlockSpec((b_tile, 1), lambda bi, pj: (bi, 0)),
        scratch_shapes=[pltpu.VMEM((b_tile, 1), jnp.float32),
                        pltpu.VMEM((b_tile, 1), jnp.float32),
                        pltpu.VMEM((b_tile, 1), jnp.float32)],
        compiler_params=pltpu.CompilerParams(
            dimension_semantics=("parallel", "arbitrary"),
            vmem_limit_bytes=_vmem_limit(block_bytes, scratch_bytes)),
    )(q_pad, pt_pad)
    return jnp.sum(nll[:B, 0]) / B


# ----------------------------------------------------------------------------
# Training loss, grouped negatives: scores[b] = q[b] . p_group[b], target = 0
# Only [B, sample_num] scores are computed (no B x P matmul + masking).
# ----------------------------------------------------------------------------
def _grouped_loss_kernel(q_ref, pg_ref, nll_ref):
    q = q_ref[...].astype(jnp.float32)                 # [B, H]
    p = pg_ref[...].astype(jnp.float32)                # [B, S, H]
    s = jnp.sum(q[:, None, :] * p, axis=-1)            # [B, S]
    m = jnp.max(s, axis=-1, keepdims=True)
    lse = m + jnp.log(jnp.sum(jnp.exp(s - m), axis=-1, keepdims=True))
    nll_ref[...] = lse - s[:, 0:1]                     # target = 0 per group


def _grouped_loss(q_cls, p_cls, sample_num):
    B, H = q_cls.shape
    P = p_cls.shape[0]
    assert P == B * sample_num, "grouped negatives require P == B * sample_num"
    p_g = p_cls.reshape(B, sample_num, H)
    dsize = jnp.dtype(q_cls.dtype).itemsize
    block_bytes = (B * H + B * sample_num * H) * dsize + B * 4
    nll = pl.pallas_call(
        _grouped_loss_kernel,
        out_shape=jax.ShapeDtypeStruct((B, 1), jnp.float32),
        grid=(1,),
        in_specs=[pl.BlockSpec((B, H), lambda i: (0, 0)),
                  pl.BlockSpec((B, sample_num, H), lambda i: (0, 0, 0))],
        out_specs=pl.BlockSpec((B, 1), lambda i: (0, 0)),
        compiler_params=pltpu.CompilerParams(
            dimension_semantics=("arbitrary",),
            vmem_limit_bytes=_vmem_limit(block_bytes)),
    )(q_cls, p_g)
    return jnp.mean(nll[:, 0])


# ----------------------------------------------------------------------------
# Eval branch: full similarity matrix q_reps @ p_reps.T, tiled over P.
# ----------------------------------------------------------------------------
def _scores_kernel(q_ref, pt_ref, out_ref):
    out_ref[...] = jnp.dot(q_ref[...], pt_ref[...],
                           preferred_element_type=jnp.float32
                           ).astype(out_ref.dtype)


def dual_encoder_scores(q_hidden, p_hidden):
    q_cls = q_hidden[:, 0, :]
    p_cls = p_hidden[:, 0, :]
    B, H = q_cls.shape
    P = p_cls.shape[0]

    B_pad = _round_up(B, 8)
    P_pad = _round_up(P, 128)
    p_tile = min(P_pad, 512)
    P_pad = _round_up(P_pad, p_tile)
    num_p = P_pad // p_tile

    q_pad = jnp.pad(q_cls, ((0, B_pad - B), (0, 0)))
    pt_pad = jnp.pad(p_cls.T, ((0, 0), (0, P_pad - P)))

    dsize = jnp.dtype(q_pad.dtype).itemsize
    block_bytes = (B_pad * H + H * p_tile) * dsize + B_pad * p_tile * 4
    scores = pl.pallas_call(
        _scores_kernel,
        out_shape=jax.ShapeDtypeStruct((B_pad, P_pad), jnp.float32),
        grid=(num_p,),
        in_specs=[pl.BlockSpec((B_pad, H), lambda j: (0, 0)),
                  pl.BlockSpec((H, p_tile), lambda j: (0, j))],
        out_specs=pl.BlockSpec((B_pad, p_tile), lambda j: (0, j)),
        compiler_params=pltpu.CompilerParams(
            dimension_semantics=("parallel",),
            vmem_limit_bytes=_vmem_limit(block_bytes)),
    )(q_pad, pt_pad)
    return scores[:B, :P]


# ----------------------------------------------------------------------------
# Encode-only branches: CLS pooling.  DMAs the position-0 slab straight into
# the output ref (no scratch, no extra VPU pass).
# ----------------------------------------------------------------------------
def _cls_pool_kernel(hid_hbm, out_ref, sem):
    cp = pltpu.make_async_copy(hid_hbm.at[:, pl.ds(0, 1), :], out_ref, sem.at[0])
    cp.start()
    cp.wait()


def cls_pool(hidden):
    B, _, H = hidden.shape
    out = pl.pallas_call(
        _cls_pool_kernel,
        out_shape=jax.ShapeDtypeStruct((B, 1, H), hidden.dtype),
        grid=(1,),
        in_specs=[pl.BlockSpec(memory_space=pl.ANY)],
        out_specs=pl.BlockSpec((B, 1, H), lambda i: (0, 0, 0)),
        scratch_shapes=[pltpu.SemaphoreType.DMA((1,))],
        compiler_params=pltpu.CompilerParams(dimension_semantics=("arbitrary",)),
    )(hidden)
    return out[:, 0, :]


# ----------------------------------------------------------------------------
# forward() mirroring DualEncoder.forward branching
# ----------------------------------------------------------------------------
def dual_encoder_forward(q_hidden=None, p_hidden=None, *, training=False,
                         sample_num=1, negatives_in_device=True,
                         negatives_x_device=False):
    # TODO(synk): negatives_x_device (torch.distributed.all_gather of reps) is not
    # implemented — single-device script; it would use pltpu.make_async_remote_copy.
    del negatives_x_device
    if training:
        q_cls = q_hidden[:, 0, :]        # CLS pooling (pure data movement)
        p_cls = p_hidden[:, 0, :]
        if negatives_in_device:
            return _in_device_loss(q_cls, p_cls)
        return _grouped_loss(q_cls, p_cls, sample_num)
    elif q_hidden is not None and p_hidden is not None:
        return dual_encoder_scores(q_hidden, p_hidden)
    elif p_hidden is not None:
        return cls_pool(p_hidden)
    else:
        return cls_pool(q_hidden)


# ----------------------------------------------------------------------------
# Pure numpy reference
# ----------------------------------------------------------------------------
def _ref_loss(q_hidden, p_hidden, sample_num, negatives_in_device):
    q = q_hidden[:, 0].astype(np.float64)
    p = p_hidden[:, 0].astype(np.float64)
    B, H = q.shape
    P = p.shape[0]
    if negatives_in_device:
        scores = q @ p.T
        tgt = np.arange(B) * (P // B)
    else:
        pg = p.reshape(-1, sample_num, H)
        scores = np.einsum("bh,bsh->bs", q, pg)
        tgt = np.zeros(B, dtype=np.int64)
    m = scores.max(-1, keepdims=True)
    lse = np.log(np.exp(scores - m).sum(-1, keepdims=True)) + m
    lsm = scores - lse
    return -np.mean(lsm[np.arange(B), tgt])


if __name__ == "__main__":
    B, sample_num = 2, 4
    Bp = B * sample_num
    Lq, Lp, H = 8, 16, 32

    key = jax.random.PRNGKey(0)
    kq, kp = jax.random.split(key)
    q_hidden = jax.random.normal(kq, (B, Lq, H), dtype=jnp.float32)
    p_hidden = jax.random.normal(kp, (Bp, Lp, H), dtype=jnp.float32)

    # training branch: in-batch negatives and grouped negatives
    loss_in = dual_encoder_forward(q_hidden, p_hidden, training=True,
                                   sample_num=sample_num, negatives_in_device=True)
    loss_grp = dual_encoder_forward(q_hidden, p_hidden, training=True,
                                    sample_num=sample_num, negatives_in_device=False)
    # eval branches
    scores = dual_encoder_forward(q_hidden, p_hidden, training=False)
    q_reps = dual_encoder_forward(q_hidden=q_hidden, training=False)
    p_reps = dual_encoder_forward(p_hidden=p_hidden, training=False)

    loss_in, loss_grp, scores, q_reps, p_reps = jax.block_until_ready(
        (loss_in, loss_grp, scores, q_reps, p_reps))

    qn = np.asarray(q_hidden)
    pn = np.asarray(p_hidden)
    np.testing.assert_allclose(float(loss_in),
                               _ref_loss(qn, pn, sample_num, True),
                               rtol=1e-4, atol=1e-5)
    np.testing.assert_allclose(float(loss_grp),
                               _ref_loss(qn, pn, sample_num, False),
                               rtol=1e-4, atol=1e-5)
    np.testing.assert_allclose(np.asarray(scores),
                               qn[:, 0].astype(np.float64) @ pn[:, 0].T.astype(np.float64),
                               rtol=1e-4, atol=1e-5)
    np.testing.assert_allclose(np.asarray(q_reps), qn[:, 0], rtol=0, atol=0)
    np.testing.assert_allclose(np.asarray(p_reps), pn[:, 0], rtol=0, atol=0)
    print("KERNEL_OK")
</pallas_src>

<mosaic_0001>
module attributes {stable_mosaic.version = 11 : i64} {
  func.func @_in_device_loss_kernel(%arg0: i32, %arg1: i32, %arg2: memref<8x32xf32, #tpu.memory_space<vmem>>, %arg3: memref<32x128xf32, #tpu.memory_space<vmem>>, %arg4: memref<8x1xf32, #tpu.memory_space<vmem>>, %arg5: memref<8x1xf32, #tpu.memory_space<vmem>>, %arg6: memref<8x1xf32, #tpu.memory_space<vmem>>, %arg7: memref<8x1xf32, #tpu.memory_space<vmem>>) attributes {dimension_semantics = [#tpu.dimension_semantics<parallel>, #tpu.dimension_semantics<arbitrary>], iteration_bounds = array<i64: 1, 1>, scalar_prefetch = 0 : i64, scratch_operands = 3 : i64, tpu.core_type = #tpu.core_type<tc>, window_params = [{transform_indices = @transform_0, window_bounds = array<i64: 8, 32>}, {transform_indices = @transform_1, window_bounds = array<i64: 32, 128>}, {transform_indices = @transform_2, window_bounds = array<i64: 8, 1>}]} {
    %c0_i32 = arith.constant 0 : i32
    %0 = arith.cmpi eq, %arg1, %c0_i32 : i32
    %1 = arith.extui %0 : i1 to i32
    %c0_i32_0 = arith.constant 0 : i32
    %2 = arith.cmpi ne, %1, %c0_i32_0 : i32
    scf.if %2 {
      %cst_24 = arith.constant -1.000000e+30 : f32
      %47 = vector.broadcast %cst_24 : f32 to vector<8x1xf32>
      %c0_25 = arith.constant 0 : index
      %c0_26 = arith.constant 0 : index
      %48 = vector.load %arg5[%c0_25, %c0_26] : memref<8x1xf32, #tpu.memory_space<vmem>>, vector<8x1xf32>
      tpu.vector_store %arg5[%c0_25, %c0_26], %47 {strides = array<i32>} : memref<8x1xf32, #tpu.memory_space<vmem>>, vector<8x1xf32>,
      %cst_27 = arith.constant 0.000000e+00 : f32
      %49 = vector.broadcast %cst_27 : f32 to vector<8x1xf32>
      %c0_28 = arith.constant 0 : index
      %c0_29 = arith.constant 0 : index
      %50 = vector.load %arg6[%c0_28, %c0_29] : memref<8x1xf32, #tpu.memory_space<vmem>>, vector<8x1xf32>
      tpu.vector_store %arg6[%c0_28, %c0_29], %49 {strides = array<i32>} : memref<8x1xf32, #tpu.memory_space<vmem>>, vector<8x1xf32>,
      %cst_30 = arith.constant 0.000000e+00 : f32
      %51 = vector.broadcast %cst_30 : f32 to vector<8x1xf32>
      %c0_31 = arith.constant 0 : index
      %c0_32 = arith.constant 0 : index
      %52 = vector.load %arg7[%c0_31, %c0_32] : memref<8x1xf32, #tpu.memory_space<vmem>>, vector<8x1xf32>
      tpu.vector_store %arg7[%c0_31, %c0_32], %51 {strides = array<i32>} : memref<8x1xf32, #tpu.memory_space<vmem>>, vector<8x1xf32>,
    } else {
    }
    %c0 = arith.constant 0 : index
    %c0_1 = arith.constant 0 : index
    %3 = vector.load %arg2[%c0, %c0_1] : memref<8x32xf32, #tpu.memory_space<vmem>>, vector<8x32xf32>
    %c0_2 = arith.constant 0 : index
    %c0_3 = arith.constant 0 : index
    %4 = vector.load %arg3[%c0_2, %c0_3] : memref<32x128xf32, #tpu.memory_space<vmem>>, vector<32x128xf32>
    %cst = arith.constant dense<0.000000e+00> : vector<8x128xf32>
    %5 = tpu.matmul %3, %4, %cst {dimension_numbers = #tpu.dot_dimension_numbers<[1], [0], [0], [1], [0, 0, 1, 1], [], []>} : vector<8x32xf32>, vector<32x128xf32>, vector<8x128xf32> -> vector<8x128xf32>
    %6 = tpu.iota {dimensions = array<i32: 1>} : vector<8x128xi32>
    %c128_i32 = arith.constant 128 : i32
    %7 = arith.muli %arg1, %c128_i32 : i32
    %8 = vector.broadcast %7 : i32 to vector<8x128xi32>
    %9 = arith.addi %6, %8 : vector<8x128xi32>
    %c8_i32 = arith.constant 8 : i32
    %10 = vector.broadcast %c8_i32 : i32 to vector<8x128xi32>
    %11 = arith.cmpi slt, %9, %10 : vector<8x128xi32>
    %cst_4 = arith.constant -1.000000e+30 : f32
    %12 = vector.broadcast %cst_4 : f32 to vector<8x128xf32>
    %13 = arith.select %11, %5, %12 : vector<8x128xi1>, vector<8x128xf32>
    %14 = tpu.iota {dimensions = array<i32: 0>} : vector<8x128xi32>
    %c8_i32_5 = arith.constant 8 : i32
    %15 = arith.muli %arg0, %c8_i32_5 : i32
    %16 = vector.broadcast %15 : i32 to vector<8x128xi32>
    %17 = arith.addi %14, %16 : vector<8x128xi32>
    %c0_6 = arith.constant 0 : index
    %c0_7 = arith.constant 0 : index
    %18 = vector.load %arg7[%c0_6, %c0_7] : memref<8x1xf32, #tpu.memory_space<vmem>>, vector<8x1xf32>
    %c4_i32 = arith.constant 4 : i32
    %19 = vector.broadcast %c4_i32 : i32 to vector<8x128xi32>
    %20 = arith.muli %17, %19 : vector<8x128xi32>
    %21 = arith.cmpi eq, %9, %20 : vector<8x128xi32>
    %cst_8 = arith.constant 0.000000e+00 : f32
    %22 = vector.broadcast %cst_8 : f32 to vector<8x128xf32>
    %23 = arith.select %21, %13, %22 : vector<8x128xi1>, vector<8x128xf32>
    %cst_9 = arith.constant dense<0.000000e+00> : vector<8xf32>
    %24 = vector.multi_reduction <add>, %23, %cst_9 [1] : vector<8x128xf32> to vector<8xf32>
    %25 = vector.shape_cast %24 : vector<8xf32> to vector<8x1xf32>
    %26 = arith.addf %18, %25 : vector<8x1xf32>
    %c0_10 = arith.constant 0 : index
    %c0_11 = arith.constant 0 : index
    %27 = vector.load %arg7[%c0_10, %c0_11] : memref<8x1xf32, #tpu.memory_space<vmem>>, vector<8x1xf32>
    tpu.vector_store %arg7[%c0_10, %c0_11], %26 {strides = array<i32>} : memref<8x1xf32, #tpu.memory_space<vmem>>, vector<8x1xf32>,
    %c0_12 = arith.constant 0 : index
    %c0_13 = arith.constant 0 : index
    %28 = vector.load %arg5[%c0_12, %c0_13] : memref<8x1xf32, #tpu.memory_space<vmem>>, vector<8x1xf32>
    %cst_14 = arith.constant dense<0xFF800000> : vector<8xf32>
    %29 = vector.multi_reduction <maximumf>, %13, %cst_14 [1] : vector<8x128xf32> to vector<8xf32>
    %30 = vector.shape_cast %29 : vector<8xf32> to vector<8x1xf32>
    %31 = arith.maximumf %28, %30 : vector<8x1xf32>
    %32 = arith.subf %28, %31 : vector<8x1xf32>
    %33 = math.exp %32 : vector<8x1xf32>
    %c0_15 = arith.constant 0 : index
    %c0_16 = arith.constant 0 : index
    %34 = vector.load %arg6[%c0_15, %c0_16] : memref<8x1xf32, #tpu.memory_space<vmem>>, vector<8x1xf32>
    %35 = arith.mulf %34, %33 : vector<8x1xf32>
    %36 = vector.broadcast %31 : vector<8x1xf32> to vector<8x128xf32>
    %37 = arith.subf %13, %36 : vector<8x128xf32>
    %38 = math.exp %37 : vector<8x128xf32>
    %cst_17 = arith.constant dense<0.000000e+00> : vector<8xf32>
    %39 = vector.multi_reduction <add>, %38, %cst_17 [1] : vector<8x128xf32> to vector<8xf32>
    %40 = vector.shape_cast %39 : vector<8xf32> to vector<8x1xf32>
    %41 = arith.addf %35, %40 : vector<8x1xf32>
    %c0_18 = arith.constant 0 : index
    %c0_19 = arith.constant 0 : index
    %42 = vector.load %arg6[%c0_18, %c0_19] : memref<8x1xf32, #tpu.memory_space<vmem>>, vector<8x1xf32>
    tpu.vector_store %arg6[%c0_18, %c0_19], %41 {strides = array<i32>} : memref<8x1xf32, #tpu.memory_space<vmem>>, vector<8x1xf32>,
    %c0_20 = arith.constant 0 : index
    %c0_21 = arith.constant 0 : index
    %43 = vector.load %arg5[%c0_20, %c0_21] : memref<8x1xf32, #tpu.memory_space<vmem>>, vector<8x1xf32>
    tpu.vector_store %arg5[%c0_20, %c0_21], %31 {strides = array<i32>} : memref<8x1xf32, #tpu.memory_space<vmem>>, vector<8x1xf32>,
    %c0_i32_22 = arith.constant 0 : i32
    %44 = arith.cmpi eq, %arg1, %c0_i32_22 : i32
    %45 = arith.extui %44 : i1 to i32
    %c0_i32_23 = arith.constant 0 : i32
    %46 = arith.cmpi ne, %45, %c0_i32_23 : i32
    scf.if %46 {
      %c0_24 = arith.constant 0 : index
      %c0_25 = arith.constant 0 : index
      %47 = vector.load %arg5[%c0_24, %c0_25] : memref<8x1xf32, #tpu.memory_space<vmem>>, vector<8x1xf32>
      %c0_26 = arith.constant 0 : index
      %c0_27 = arith.constant 0 : index
      %48 = vector.load %arg6[%c0_26, %c0_27] : memref<8x1xf32, #tpu.memory_space<vmem>>, vector<8x1xf32>
      %49 = math.log %48 : vector<8x1xf32>
      %50 = arith.addf %47, %49 : vector<8x1xf32>
      %c0_28 = arith.constant 0 : index
      %c0_29 = arith.constant 0 : index
      %51 = vector.load %arg7[%c0_28, %c0_29] : memref<8x1xf32, #tpu.memory_space<vmem>>, vector<8x1xf32>
      %52 = arith.subf %50, %51 : vector<8x1xf32>
      %c0_30 = arith.constant 0 : index
      %c0_31 = arith.constant 0 : index
      %53 = vector.load %arg4[%c0_30, %c0_31] : memref<8x1xf32, #tpu.memory_space<vmem>>, vector<8x1xf32>
      tpu.vector_store %arg4[%c0_30, %c0_31], %52 {strides = array<i32>} : memref<8x1xf32, #tpu.memory_space<vmem>>, vector<8x1xf32>,
    } else {
    }
    return
  }
  func.func @transform_0(%arg0: i32, %arg1: i32) -> (i32, i32) {
    %c0_i32 = arith.constant 0 : i32
    %c0_i32_0 = arith.constant 0 : i32
    return %arg0, %c0_i32 : i32, i32
  }
  func.func @transform_1(%arg0: i32, %arg1: i32) -> (i32, i32) {
    %c0_i32 = arith.constant 0 : i32
    %c0_i32_0 = arith.constant 0 : i32
    return %c0_i32, %arg1 : i32, i32
  }
  func.func @transform_2(%arg0: i32, %arg1: i32) -> (i32, i32) {
    %c0_i32 = arith.constant 0 : i32
    %c0_i32_0 = arith.constant 0 : i32
    return %arg0, %c0_i32 : i32, i32
  }
}

</mosaic_0001>

<bundles_post_ra>
// kernel: tpu_custom_call.1
= control target key start
LH: loop header
LB: loop body
LE: loop exit
PB: predicated region body
PF: predicated region fallthrough
CT: control target
= control target key end

     0   :  { %7 = vsyncpa [#allocation6], 0  ;;  %s342_s0 = inlined_call_operand.hbm [shape: f32[8,32], index: 0, kind: input, shape index: {}]   ;;  %s343_s1 = inlined_call_operand.hbm [shape: f32[32,128], index: 1, kind: input, shape index: {}]   ;;  %s344_s2 = inlined_call_operand.vmem [shape: f32[8,1], index: 2, kind: output, shape index: {}]  }
   0x1   :  { %8 = vsyncpa [#allocation8], 0  ;;  %s271_s9 = smov [#allocation5]   ;;  %s272_s11 = smov [#allocation7]  }
   0x2   :  { %s15_s10 = sshll.u32 %s271_s9, 4  ;;  %s24_s12 = sshll.u32 %s272_s11, 4  ;;  %s16_s10 = int_to_ptr.vmem [resolvable:$true] %s15_s10  ;;  %s295_s12 = int_to_ptr.vmem [resolvable:$true] %s24_s12 }
   0x3   :  { %s223_s15 = scalar_lea.hbm %s342_s0, 128 }
   0x4   :  { %p224_p0 = scmp.ne.s32.totalorder %s342_s0, %s223_s15  ;;  %p227_p1 = scmp.lt.u32.totalorder %s223_s15, %s342_s0 }
   0x6   :  { %p229_p2 = pnand %p227_p1, %p224_p0 }
   0x8   :  { %232 = shalt.err (!%p229_p2)
}
   0x9   :  { %s233_s20 = scalar_lea.vmem %s16_s10, 128  ;;  %p238_p4 = scmp.lt.s32.totalorder %s16_s10, %s16_s10 }
   0xa   :  { %p234_p3 = scmp.ne.s32.totalorder %s16_s10, %s233_s20  ;;  %p239_p5 = scmp.lt.s32.totalorder %s233_s20, %s233_s20 }
   0xc   :  { %p240_p6 = por %p239_p5, %p238_p4 }
   0xe   :  { %p241_p7 = pnand %p240_p6, %p234_p3 }
  0x10   :  { %244 = shalt.err (!%p241_p7)
}
  0x11   :  { %18 = dma.hbm_to_vmem [thread:$0]  %s342_s0, 128, %s16_s10, [#allocation6]  }
  0x12   :  { %s245_s25 = scalar_lea.hbm %s343_s1, 512 }
  0x13   :  { %p246_p8 = scmp.ne.s32.totalorder %s343_s1, %s245_s25  ;;  %p249_p9 = scmp.lt.u32.totalorder %s245_s25, %s343_s1 }
  0x15   :  { %p251_p10 = pnand %p249_p9, %p246_p8 }
  0x17   :  { %254 = shalt.err (!%p251_p10)
}
  0x18   :  { %s255_s30 = scalar_lea.vmem %s295_s12, 512  ;;  %p260_p12 = scmp.lt.s32.totalorder %s295_s12, %s295_s12 }
  0x19   :  { %p256_p11 = scmp.ne.s32.totalorder %s295_s12, %s255_s30  ;;  %p261_p13 = scmp.lt.s32.totalorder %s255_s30, %s255_s30 }
  0x1b   :  { %p262_p0 = por %p261_p13, %p260_p12 }
  0x1d   :  { %p263_p1 = pnand %p262_p0, %p256_p11 }
  0x1f   :  { %266 = shalt.err (!%p263_p1)
}
  0x20   :  { %s273_s0 = smov 128   ;;  %s274_s3 = smov 8  }
  0x21   :  { %30 = dma.hbm_to_vmem [thread:$0]  %s343_s1, 512, %s295_s12, [#allocation8], %s273_s0, %s273_s0, %s274_s3  }
  0x22   :  { %267 = dma.done.wait [#allocation6], 128  }
  0x23   :  { %268 = vsyncadd [#allocation6], 4294967168 }
  0x24   :  { %269 = dma.done.wait [#allocation8], 512  }
  0x25   :  { %270 = vsyncadd [#allocation8], 4294966784  ;;  %vm41_vm0 = vcmask 7168   ;;  %v275_v0 = vmov 0.0|0.0   ;;  %v276_v1 = vmov 0.0   ;;  %vm277_vm1 = vmmov 0  }
  0x26   :  { %201 = vmatprep.subr.bf16.mxu0 %v275_v0  ;;  %43 = vst.msk [vmem:[#allocation3] sm:$0xff] %vm41_vm0, %v276_v1  ;;  %44 = vst.msk [vmem:[#allocation4] sm:$0xff] %vm41_vm0, %v276_v1  ;;  %198 = vmatprep.mubr.msk.f32.mxu0 %vm277_vm1, %v276_v1  ;;  %v46_v2 = vld [vmem:[#allocation7] sm:$0xff]  ;;  %v47_v3 = vld [vmem:[#allocation7 + $0x8] sm:$0xff]  ;;  %vm50_vm2 = vcmask 261120   ;;  %v124_v9 = vlaneseq  ;;  %v279_v18 = vmov 0  }
  0x27   :  { %v48_v4 = vld [vmem:[#allocation7 + $0x10] sm:$0xff]  ;;  %v202_v5 = vpack.c.bf16 %v47_v3, %v46_v2  ;;  %v49_v6 = vld [vmem:[#allocation7 + $0x18] sm:$0xff]  ;;  %v278_v14 = vmov -1e+30   ;;  %216 = vset.pattern.permute.xlu0 %v279_v18 }
  0x28   :  { %v205_v7 = vpack.c.bf16 %v49_v6, %v48_v4  ;;  %v45_v8 = vld [vmem:[#allocation5] sm:$0xff]  ;;  %v132_v10 = vshrl.u32 %v124_v9, 7  ;;  %v125_v11 = vand.u32 127, %v124_v9  ;;  %42 = vst.msk [vmem:[#allocation2] sm:$0xff] %vm41_vm0, %v278_v14 }
  0x29   :  { %203 = vmatpush3.bf16.msra.mxu0 %v202_v5 }
  0x2a   :  { %204 = vmatprep.subr.bf16.mxu0 %v275_v0  ;;  %v137_v12 = vmul.u32 4, %v132_v10  ;;  %vm129_vm4 = vcmp.lt.s32.totalorder %v125_v11, 8 }
  0x2c   :  { %vm328_vm3 = vcmp.eq.s32.totalorder %v125_v11, %v137_v12 }
  0x2d   :  { %206 = vmatpush3.bf16.msra.mxu0 %v205_v7  ;;  %v152_v30 = vld [vmem:[#allocation3] sm:$0xff]  ;;  %v136_v34 = vld [vmem:[#allocation4] sm:$0xff] }
  0x2f   :  { %v145_v19 = vld [vmem:[#allocation2] sm:$0xff] }
  0x30   :  { %199 = vmatmul.mubr.msk.f32.vlgmr.msra.gmra.mrb[0].mxu0 %vm50_vm2, %v45_v8 }
 0x103   :  { %v120_v15 = vpop.f32.mrb[0].mxu0 }
 0x104   :  { %v130_v16 = vsel %vm129_vm4, %v120_v15, -1e+30  ;;  %v200_v17 = vpop.f32.mrb[1].mxu0 }
 0x105   :  { %146 = vmax.xlane.f32.xlu0 %v130_v16  ;;  %v139_v27 = vsel %vm328_vm3, %v130_v16, 0.0 }
 0x192   :  { %v147_v20 = vpop.xlane.xlu0 %146 }
 0x193   :  { %v148_v21 = vmax.f32 %v145_v19, %v147_v20 }
 0x195   :  { %v149_v22 = vsub.f32 %v145_v19, %v148_v21  ;;  %166 = vst.msk [vmem:[#allocation2] sm:$0xff] %vm41_vm0, %v148_v21  ;;  %156 = vperm.xlu0 %216, %v148_v21  }
 0x197   :  { %v150_v28 = vmul.f32 1.442695, %v149_v22 }
 0x19c   :  { %v170_v40 = vld [vmem:[#allocation2] sm:$0xff] }
 0x214   :  { %v157_v23 = vpop.permute.xlu0 %156 }
 0x215   :  { %v159_v24 = vsub.f32 %v130_v16, %v157_v23 }
 0x217   :  { %v160_v25 = vmul.f32 1.442695, %v159_v24 }
 0x219   :  { %217 = vpow2.f32 %v160_v25 }
 0x21a   :  { %219 = vpow2.f32 %v150_v28 }
 0x223   :  { %v218_v26 = vpop.eup %217 }
 0x224   :  { %162 = vadd.xlane.f32.xlu1 %v218_v26  ;;  %v220_v29 = vpop.eup %219 }
 0x225   :  { %v153_v31 = vmul.f32 %v220_v29, %v152_v30 }
 0x228   :  { %140 = vadd.xlane.f32.xlu1 %v139_v27 }
 0x2b1   :  { %v163_v32 = vpop.xlane.xlu1 %162 }
 0x2b2   :  { %v164_v33 = vadd.f32 %v163_v32, %v153_v31 }
 0x2b4   :  { %165 = vst.msk [vmem:[#allocation3] sm:$0xff] %vm41_vm0, %v164_v33 }
 0x2b5   :  { %v141_v35 = vpop.xlane.xlu1 %140 }
 0x2b6   :  { %v142_v36 = vadd.f32 %v141_v35, %v136_v34 }
 0x2b8   :  { %144 = vst.msk [vmem:[#allocation4] sm:$0xff] %vm41_vm0, %v142_v36 }
 0x2bb   :  { %v171_v37 = vld [vmem:[#allocation3] sm:$0xff] }
 0x2bc   :  { %221 = vlog2.f32 %v171_v37 }
 0x2bf   :  { %v175_v42 = vld [vmem:[#allocation4] sm:$0xff] }
 0x2c6   :  { %v222_v38 = vpop.eup %221 }
 0x2c7   :  { %v173_v39 = vmul.f32 0.6931472, %v222_v38 }
 0x2c9   :  { %v174_v41 = vadd.f32 %v173_v39, %v170_v40 }
 0x2cb   :  { %v176_v43 = vsub.f32 %v174_v41, %v175_v42 }
 0x2cd   :  { %177 = vst.msk [vmem:[%s344_s2] sm:$0xff] %vm41_vm0, %v176_v43 }
 0x2ce   :  { %182 = vsyncpa [#allocation6], 1 }
 0x2cf   :  { %183 = vsyncpa [#allocation8], 1 }

</bundles_post_ra>
